<compile_context>
chip_gen: v7x
topology: tpu7x:2x2x1
jax: 0.10.0
libtpu: 0.0.40
codegen_flags: <defaults>
</compile_context>

<pallas_src>
import functools

import numpy as np
import jax
import jax.numpy as jnp
from jax.experimental import pallas as pl
from jax.experimental.pallas import tpu as pltpu

_LANES = 128
_TABLE_SIZE = 64  # 8*8; 128 lanes hold exactly two flattened table periods


def _round_up(x, m):
    return ((x + m - 1) // m) * m


def _sublane_granule(dtype):
    # Minimal second-minor tile for the packed layout of `dtype` (f32: 8,
    # bf16/int16: 16, int8/uint8: 32).
    return max(8, 32 // jnp.dtype(dtype).itemsize)


def _y_quantize_kernel(rounding, scale_ref, img_ref, out_ref):
    # scale_ref: VMEM (8, 128)   (y_table*factor) flattened, lane-tiled, sublane-replicated
    # img_ref:   VMEM (TR, 128)  lane-dense tile of the flattened image (native dtype)
    # out_ref:   VMEM (TR, 128)
    tr = img_ref.shape[0]
    x = img_ref[...].astype(jnp.float32)      # image.float(), done per-tile in VMEM
    x = x.reshape(tr // 8, 8, _LANES)         # free: groups sublanes into natural vregs
    # Keep true division for bit-exact parity with the PyTorch forward
    # (reciprocal-multiply can flip jnp.round at exact .5 ties).
    y = rounding(x / scale_ref[...])
    out_ref[...] = y.reshape(tr, _LANES).astype(out_ref.dtype)


def y_quantize(image, y_table, *, factor=1.0, rounding=jnp.round,
               block_rows=4096, out_dtype=jnp.float32):
    """rounding(image.astype(f32) / (y_table * factor)) for image of shape (..., 8, 8)."""
    orig_shape = image.shape
    assert orig_shape[-2:] == (8, 8), "expected trailing 8x8 DCT blocks"
    # TODO(synk): per-image/batched `factor` (e.g. shape (B,1,1)) is not supported;
    # `factor` must be a scalar, matching the reference module's float attribute.

    # Per-lane quantization scale: flatten the 8x8 table (row-major, matching the
    # flattened image layout), tile to 128 lanes, replicate across 8 sublanes so
    # the kernel reads one natural (8,128) vreg with no sublane broadcast.
    scale_row = jnp.tile(
        (y_table.astype(jnp.float32) * factor).reshape(-1),
        _LANES // _TABLE_SIZE,
    )
    scale_blk = jnp.tile(scale_row.reshape(1, _LANES), (8, 1))  # (8, 128)

    # Flatten to a lane-dense (rows, 128) slab in the input's NATIVE dtype
    # (cast happens inside the kernel).  total is a multiple of 64; pad at most
    # 64 elements to reach a whole number of 128-lane rows (usually pad == 0).
    flat = image.reshape(-1)
    total = flat.shape[0]
    rows = pl.cdiv(total, _LANES)
    pad = rows * _LANES - total
    if pad:
        flat = jnp.pad(flat, (0, pad))
    x2d = flat.reshape(rows, _LANES)

    granule = max(_sublane_granule(image.dtype), _sublane_granule(out_dtype))
    block_rows = _round_up(max(int(block_rows), granule), granule)
    # Cap the tile so the grid has >= 2 steps when possible (v7x: 2 TensorCores).
    half_rows = _round_up(pl.cdiv(rows, 2), granule)
    tile_rows = min(block_rows, max(granule, half_rows))
    grid = (pl.cdiv(rows, tile_rows),)   # ragged last block handled by Pallas

    out2d = pl.pallas_call(
        functools.partial(_y_quantize_kernel, rounding),
        out_shape=jax.ShapeDtypeStruct((rows, _LANES), out_dtype),
        grid=grid,
        in_specs=[
            pl.BlockSpec((8, _LANES), lambda i: (0, 0)),           # scale (resident)
            pl.BlockSpec((tile_rows, _LANES), lambda i: (i, 0)),   # image tile
        ],
        out_specs=pl.BlockSpec((tile_rows, _LANES), lambda i: (i, 0)),
        compiler_params=pltpu.CompilerParams(
            dimension_semantics=("parallel",),
        ),
    )(scale_blk, x2d)

    out = out2d.reshape(-1)
    if pad:
        out = out[:total]
    return out.reshape(orig_shape)


def _reference(image, y_table, factor=1.0, rounding=jnp.round):
    # pure-JAX reference mirroring the PyTorch forward
    return rounding(image.astype(jnp.float32) / (y_table.astype(jnp.float32) * factor))


if __name__ == "__main__":
    # Standard JPEG luminance quantization table (transposed, as in the module).
    y_table_np = np.array(
        [[16, 11, 10, 16, 24, 40, 51, 61],
         [12, 12, 14, 19, 26, 58, 60, 55],
         [14, 13, 16, 24, 40, 57, 69, 56],
         [14, 17, 22, 29, 51, 87, 80, 62],
         [18, 22, 37, 56, 68, 109, 103, 77],
         [24, 35, 55, 64, 81, 104, 113, 92],
         [49, 64, 78, 87, 103, 121, 120, 101],
         [72, 92, 95, 98, 112, 100, 103, 99]], dtype=np.float32).T
    y_table = jnp.asarray(y_table_np)

    # Test 1: f32 input, even number of blocks (no pad, 2 balanced grid steps).
    key = jax.random.PRNGKey(0)
    B, N = 2, 64
    image = jax.random.uniform(
        key, (B, N, 8, 8), dtype=jnp.float32, minval=-512.0, maxval=512.0)
    out = jax.block_until_ready(y_quantize(image, y_table, factor=1.0))
    ref = _reference(image, y_table, factor=1.0)
    assert out.shape == image.shape
    assert out.dtype == jnp.float32
    assert jnp.allclose(out, ref, atol=1e-5, rtol=1e-6)

    # Test 2: bf16 input (in-kernel f32 cast), odd number of 8x8 blocks
    # (tiny 64-element pad + ragged last grid block), factor != 1.
    key2 = jax.random.PRNGKey(1)
    image2 = jax.random.uniform(
        key2, (1, 65, 8, 8), dtype=jnp.float32, minval=-512.0, maxval=512.0
    ).astype(jnp.bfloat16)
    out2 = jax.block_until_ready(y_quantize(image2, y_table, factor=2.0))
    ref2 = _reference(image2, y_table, factor=2.0)
    assert out2.shape == image2.shape
    assert jnp.allclose(out2, ref2, atol=1e-5, rtol=1e-6)

    print("KERNEL_OK")
</pallas_src>

<mosaic_0001>
module attributes {stable_mosaic.version = 11 : i64} {
  func.func @_y_quantize_kernel(%arg0: i32, %arg1: memref<8x128xf32, #tpu.memory_space<vmem>>, %arg2: memref<32x128xf32, #tpu.memory_space<vmem>>, %arg3: memref<32x128xf32, #tpu.memory_space<vmem>>) attributes {dimension_semantics = [#tpu.dimension_semantics<parallel>], iteration_bounds = array<i64: 2>, scalar_prefetch = 0 : i64, scratch_operands = 0 : i64, tpu.core_type = #tpu.core_type<tc>, window_params = [{pipeline_mode = #tpu.pipeline_mode<synchronous>, transform_indices = @transform_0, window_bounds = array<i64: 8, 128>}, {transform_indices = @transform_1, window_bounds = array<i64: 32, 128>}, {transform_indices = @transform_2, window_bounds = array<i64: 32, 128>}]} {
    %c0 = arith.constant 0 : index
    %c0_0 = arith.constant 0 : index
    %0 = vector.load %arg2[%c0, %c0_0] : memref<32x128xf32, #tpu.memory_space<vmem>>, vector<32x128xf32>
    %1 = vector.shape_cast %0 : vector<32x128xf32> to vector<4x8x128xf32>
    %c0_1 = arith.constant 0 : index
    %c0_2 = arith.constant 0 : index
    %2 = vector.load %arg1[%c0_1, %c0_2] : memref<8x128xf32, #tpu.memory_space<vmem>>, vector<8x128xf32>
    %3 = vector.shape_cast %2 : vector<8x128xf32> to vector<1x8x128xf32>
    %4 = vector.broadcast %3 : vector<1x8x128xf32> to vector<4x8x128xf32>
    %5 = arith.divf %1, %4 : vector<4x8x128xf32>
    %6 = math.roundeven %5 : vector<4x8x128xf32>
    %7 = vector.shape_cast %6 : vector<4x8x128xf32> to vector<32x128xf32>
    %c0_3 = arith.constant 0 : index
    %c0_4 = arith.constant 0 : index
    %8 = vector.load %arg3[%c0_3, %c0_4] : memref<32x128xf32, #tpu.memory_space<vmem>>, vector<32x128xf32>
    tpu.vector_store %arg3[%c0_3, %c0_4], %7 {strides = array<i32>} : memref<32x128xf32, #tpu.memory_space<vmem>>, vector<32x128xf32>,
    return
  }
  func.func @transform_0(%arg0: i32) -> (i32, i32) {
    %c0_i32 = arith.constant 0 : i32
    %c0_i32_0 = arith.constant 0 : i32
    %c0_i32_1 = arith.constant 0 : i32
    return %c0_i32, %c0_i32_0 : i32, i32
  }
  func.func @transform_1(%arg0: i32) -> (i32, i32) {
    %c0_i32 = arith.constant 0 : i32
    %c0_i32_0 = arith.constant 0 : i32
    return %arg0, %c0_i32 : i32, i32
  }
  func.func @transform_2(%arg0: i32) -> (i32, i32) {
    %c0_i32 = arith.constant 0 : i32
    %c0_i32_0 = arith.constant 0 : i32
    return %arg0, %c0_i32 : i32, i32
  }
}

</mosaic_0001>

<bundles_post_ra>
// kernel: tpu_custom_call.1
= control target key start
LH: loop header
LB: loop body
LE: loop exit
PB: predicated region body
PF: predicated region fallthrough
CT: control target
= control target key end

     0   :  { %7 = vsyncpa [#allocation3], 0  ;;  %s729_s0 = inlined_call_operand.hbm [shape: f32[8,128], index: 0, kind: input, shape index: {}]   ;;  %s730_s1 = inlined_call_operand.hbm [shape: f32[64,128], index: 1, kind: input, shape index: {}]   ;;  %s731_s2 = inlined_call_operand.hbm [shape: f32[64,128], index: 2, kind: output, shape index: {}]  }
   0x1   :  { %8 = vsyncpa [#allocation6], 0 }
   0x2   :  { %10 = vsyncpa [#allocation6 + $0x1], 0 }
   0x3   :  { %11 = vsyncpa [#allocation4], 0 }
   0x4   :  { %13 = vsyncpa [#allocation4 + $0x1], 0  ;;  %s531_s9 = smov 0   ;;  %s533_s10 = smov 0  }
   0x5   :  { %s535_s11 = smov 0   ;;  %s537_s12 = smov 0  }
   0x6 LB: > { %s552_s13 = sadd.s32 4294967295, %s507_s12   ;;  %s294_s14 = sadd.s32 4294967294, %s507_s12   ;;  %s507_s12 = sphi %s537_s12, %s756_s12   ;;  %s503_s11 = sphi %s535_s11, %s755_s11   ;;  %s499_s10 = sphi %s533_s10, %s754_s10   ;;  %s495_s9 = sphi %s531_s9, %s753_s9  }
   0x7   : > { %s556_s15 = sadd.s32 1, %s507_s12   ;;  %s47_s16 = sadd.s32 1, %s503_s11 }
   0x8   : > { %s44_s17 = ssub.s32 %s507_s12, %s556_s15  ;;  %p54_p0 = scmp.ne.s32.totalorder %s503_s11, %s499_s10 }
   0x9   : > { %p45_p1 = scmp.eq.s32.totalorder %s44_s17, 0  ;;  %p55_p2 = scmp.eq.s32.totalorder %s507_s12, 0 }
   0xa   : > { %p60_p3 = scmp.ne.s32.totalorder %s499_s10, %s495_s9  ;;  %p732_p4 = scmp.eq.s32.totalorder %s552_s13, 0 }
   0xb   : > { %s568_s18 = scalar_select %p45_p1, %s503_s11, %s47_s16  }
   0xc   : > { %p570_p5 = por %p55_p2, %p54_p0  ;;  %p576_p6 = por %p732_p4, %p60_p3 }
   0xd   : > { %p84_p7 = scmp.eq.s32.totalorder %s552_s13, 1  ;;  %p90_p8 = scmp.eq.s32.totalorder %s294_s14, 1 }
   0xe   : > { %s738_s20 = scalar_select %p576_p6, 1, 0 }
   0xf   : > { %p295_p9 = scmp.ge.s32.totalorder %s507_s12, 1  ;;  %p97_p10 = scmp.lt.s32.totalorder %s507_s12, 3 }
  0x10   : > { %p583_p11 = por %p84_p7, %p54_p0  ;;  %p587_p12 = por %p90_p8, %p60_p3 }
  0x11   : > { %p591_p13 = pnand %p295_p9, %p97_p10  ;;  %s509_s24 = smov [#allocation2]  }
  0x12   : > { %s739_s21 = scalar_select %p583_p11, 1, 0 }
  0x13   : > { %s740_s22 = scalar_select %p587_p12, 1, 0 }
  0x14   : > { %s741_s23 = scalar_select %p591_p13, 1, 0 }
  0x15   : > { %p324_p2 = pneg %p591_p13  ;;  %s110_s25 = sshll.u32 %s509_s24, 4  ;;  %s111_s25 = int_to_ptr.vmem [resolvable:$true] %s110_s25 }
  0x16   : > { %p337_p4 = scmp.lt.s32.totalorder %s507_s12, 2  ;;  %p742_p0 = scmp.eq.s32.totalorder %s552_s13, 0 }
  0x17   : > { %s121_s27 = sand.u32 1, %s503_s11   ;;  %s379_s4 = scalar_lea.hbm %s729_s0, 128 }
  0x18   : > { %p601_p7 = pnand %p324_p2, %p742_p0  ;;  %p608_p3 = pnand %p337_p4, %p570_p5 }
  0x19   : > { %s298_s29 = sshll.u32 %s121_s27, 5  ;;  %p380_p8 = scmp.ne.s32.totalorder %s729_s0, %s379_s4 }
  0x1a   : > { %s744_s28 = scalar_select %p608_p3, 1, 0 }
  0x1b   : > { %p381_p9 = pneg %p601_p7  ;;  %p386_p4 = scmp.lt.u32.totalorder %s379_s4, %s729_s0 }
  0x1d   : > { %p382_p10 = pnand %p381_p9, %p380_p8 }
  0x1f   : > { %p383_p2 = pneg %p382_p10 }
  0x21   : > { %p388_p5 = pnand %p386_p4, %p383_p2 }
  0x23   : > { %391 = shalt.err (!%p388_p5)
}
  0x24   : > { %s392_s14 = scalar_lea.vmem %s111_s25, 128  ;;  %p400_p11 = scmp.lt.s32.totalorder %s111_s25, %s111_s25 }
  0x25   : > { %p393_p0 = scmp.ne.s32.totalorder %s111_s25, %s392_s14  ;;  %p401_p6 = scmp.lt.s32.totalorder %s392_s14, %s392_s14 }
  0x27   : > { %p395_p1 = pnand %p393_p0, %p381_p9  ;;  %p402_p13 = por %p401_p6, %p400_p11 }
  0x29   : > { %p396_p12 = pneg %p395_p1 }
  0x2b   : > { %p403_p3 = pnand %p402_p13, %p396_p12 }
  0x2d   : > { %406 = shalt.err (!%p403_p3)
}
  0x2e   : > { %327 = dma.hbm_to_vmem [thread:$0]  (!%p601_p7), %s729_s0, 128, %s111_s25, [#allocation3]  }
  0x2f   : > { %s310_s19 = sshll.u32 %s507_s12, 9  ;;  %s125_s24 = scalar_lea.vmem [#allocation5], %s298_s29 }
  0x30   : > { %s132_s30 = sshll.u32 %s125_s24, 4  ;;  %s632_s5 = scalar_lea.hbm %s730_s1, %s310_s19  ;;  %s634_s30 = int_to_ptr.vmem [resolvable:$true] %s132_s30 }
  0x31   : > { %s636_s26 = scalar_lea.sflag [#allocation6], %s121_s27  ;;  %s407_s6 = scalar_lea.hbm %s632_s5, 512 }
  0x32   : > { %p408_p6 = scmp.ne.s32.totalorder %s632_s5, %s407_s6  ;;  %p745_p11 = scmp.ne.s32.totalorder %s744_s28, 0 }
  0x33   : > { %s412_s7 = scalar_lea.hbm %s730_s1, 1024  ;;  %p413_p7 = scmp.lt.u32.totalorder %s632_s5, %s730_s1 }
  0x34   : > { %p409_p12 = pneg %p745_p11  ;;  %p414_p3 = scmp.lt.u32.totalorder %s412_s7, %s407_s6 }
  0x35   : > { %p416_p9 = scmp.lt.u32.totalorder %s407_s6, %s632_s5 }
  0x36   : > { %p410_p13 = pnand %p409_p12, %p408_p6  ;;  %p415_p8 = por %p414_p3, %p413_p7 }
  0x38   : > { %p411_p1 = pneg %p410_p13  ;;  %p417_p10 = por %p416_p9, %p415_p8 }
  0x3a   : > { %p418_p2 = pnand %p417_p10, %p411_p1 }
  0x3c   : > { %421 = shalt.err (!%p418_p2)
}
  0x3d   : > { %s422_s27 = scalar_lea.vmem %s634_s30, 512  ;;  %s510_s16 = smov [#allocation5]  }
  0x3e   : > { %p423_p4 = scmp.ne.s32.totalorder %s634_s30, %s422_s27  ;;  %s427_s17 = sshll.u32 %s510_s16, 4  ;;  %s428_s17 = int_to_ptr.vmem [resolvable:$false] %s427_s17 }
  0x3f   : > { %s429_s19 = scalar_lea.vmem %s428_s17, 1024  ;;  %p430_p6 = scmp.lt.s32.totalorder %s634_s30, %s428_s17 }
  0x40   : > { %p425_p5 = pnand %p423_p4, %p409_p12  ;;  %p431_p13 = scmp.lt.s32.totalorder %s429_s19, %s422_s27 }
  0x42   : > { %p426_p0 = pneg %p425_p5  ;;  %p432_p7 = por %p431_p13, %p430_p6 }
  0x44   : > { %p433_p3 = pnand %p432_p7, %p426_p0 }
  0x46   : > { %436 = shalt.err (!%p433_p3)
}
  0x47   : > { %s511_s24 = smov 128   ;;  %s512_s3 = smov 8  }
  0x48   : > { %331 = dma.hbm_to_vmem [thread:$0]  (!%p745_p11), %s632_s5, 512, %s634_s30, %s636_s26, %s511_s24, %s511_s24, %s512_s3  }
  0x49   : > { %p746_p12 = scmp.ne.s32.totalorder %s741_s23, 0 }
  0x4a   : > { %p747_p1 = scmp.eq.s32.totalorder (!%p746_p12), %s552_s13, 0 }
  0x4b   : > { %144 = sbr.rel (%p746_p12) target bundleno = 119 (0x77), region = 28 }
  0x52   : > { %482 = dma.done.wait (%p747_p1), [#allocation3], 128   ;;  %p748_p8 = pmov %p747_p1 }
  0x53   : > { %s671_s4 = sand.u32 1, %s499_s10   ;;  %p749_p9 = scmp.ne.s32.totalorder %s738_s20, 0 }
  0x54   : > { %484 = vsyncadd (%p748_p8), [#allocation3], 4294967168  ;;  %s303_s6 = sshll.u32 %s671_s4, 5  ;;  %s151_s25 = scalar_lea.sflag [#allocation6], %s671_s4 }
  0x55   : > { %s154_s29 = scalar_lea.vmem [#allocation5], %s303_s6 }
  0x56   : > { %486 = dma.done.wait (%p749_p9), %s151_s25, 512  }
  0x57   : > { %488 = vsyncadd (%p749_p9), %s151_s25, 4294966784  ;;  %v181_v0 = vld [vmem:[#allocation2] sm:$0xff]  ;;  %v177_v1 = vld [vmem:[%s154_s29] sm:$0xff]  ;;  %s174_s23 = scalar_lea.vmem [#allocation7], %s303_s6  ;;  %s311_s30 = sshll.u32 %s552_s13, 9 }
  0x58   : > { %377 = vrcp.f32 %v181_v0  ;;  %v178_v2 = vld [vmem:[%s154_s29 + $0x8] sm:$0xff]  ;;  %v179_v3 = vld [vmem:[%s154_s29 + $0x10] sm:$0xff]  ;;  %v180_v4 = vld [vmem:[%s154_s29 + $0x18] sm:$0xff]  ;;  %s209_s28 = sshll.u32 %s174_s23, 4  ;;  %s685_s26 = scalar_lea.hbm %s731_s2, %s311_s30  ;;  %s680_s28 = int_to_ptr.vmem [resolvable:$true] %s209_s28 }
  0x59   : > { %s196_s13 = scalar_lea.sflag [#allocation4], %s671_s4  ;;  %s437_s7 = scalar_lea.vmem %s680_s28, 512 }
  0x5a   : > { %p438_p11 = scmp.ne.s32.totalorder %s680_s28, %s437_s7  ;;  %p750_p10 = scmp.ne.s32.totalorder %s739_s21, 0 }
  0x5b   : > { %s513_s8 = smov [#allocation7]  }
  0x5c   : > { %p439_p2 = pnand %p438_p11, %p750_p10  ;;  %s441_s14 = sshll.u32 %s513_s8, 4  ;;  %s442_s14 = int_to_ptr.vmem [resolvable:$false] %s441_s14 }
  0x5d   : > { %s443_s27 = scalar_lea.vmem %s442_s14, 1024  ;;  %p444_p5 = scmp.lt.s32.totalorder %s680_s28, %s442_s14 }
  0x5e   : > { %p440_p4 = pneg %p439_p2  ;;  %p445_p0 = scmp.lt.s32.totalorder %s443_s27, %s437_s7 }
  0x60   : > { %p446_p6 = por %p445_p0, %p444_p5 }
  0x62   : > { %v378_v5 = vpop.eup %377  ;;  %p447_p13 = pnand %p446_p6, %p440_p4 }
  0x63   : > { %v183_v6 = vmul.f32 %v378_v5, %v177_v1  ;;  %v184_v7 = vmul.f32 %v378_v5, %v178_v2  ;;  %v185_v8 = vmul.f32 %v378_v5, %v179_v3  ;;  %v186_v9 = vmul.f32 %v378_v5, %v180_v4 }
  0x65   : > { %v312_v10 = vround.rtne.f32 %v183_v6  ;;  %v313_v11 = vround.rtne.f32 %v184_v7  ;;  %v314_v12 = vround.rtne.f32 %v185_v8  ;;  %v315_v13 = vround.rtne.f32 %v186_v9 }
  0x67   : > { %191 = vst [vmem:[%s174_s23] sm:$0xff] %v312_v10  ;;  %192 = vst [vmem:[%s174_s23 + $0x8] sm:$0xff] %v313_v11 }
  0x68   : > { %193 = vst [vmem:[%s174_s23 + $0x10] sm:$0xff] %v314_v12  ;;  %194 = vst [vmem:[%s174_s23 + $0x18] sm:$0xff] %v315_v13 }
  0x69   : > { %450 = shalt.err (!%p447_p13)
}
  0x6a   : > { %s451_s16 = scalar_lea.hbm %s685_s26, 512  ;;  %s455_s24 = scalar_lea.hbm %s731_s2, 1024 }
  0x6b   : > { %p452_p7 = scmp.ne.s32.totalorder %s685_s26, %s451_s16  ;;  %p456_p1 = scmp.lt.u32.totalorder %s685_s26, %s731_s2 }
  0x6c   : > { %p457_p8 = scmp.lt.u32.totalorder %s455_s24, %s451_s16  ;;  %p459_p11 = scmp.lt.u32.totalorder %s451_s16, %s685_s26 }
  0x6d   : > { %p453_p3 = pnand %p452_p7, %p750_p10 }
  0x6e   : > { %p458_p9 = por %p457_p8, %p456_p1 }
  0x6f   : > { %p454_p12 = pneg %p453_p3 }
  0x70   : > { %p460_p2 = por %p459_p11, %p458_p9 }
  0x72   : > { %p461_p4 = pnand %p460_p2, %p454_p12 }
  0x74   : > { %464 = shalt.err (!%p461_p4)
}
  0x75   : > { %s514_s25 = smov 128   ;;  %s515_s29 = smov 8  }
  0x76   : > { %322 = dma.vmem_to_hbm [thread:$0]  (%p750_p10), %s680_s28, 512, %s685_s26, %s196_s13, %s514_s25, %s514_s25, %s515_s29  }
  0x77 PF: > { %s224_s23 = sand.u32 1, %s495_s9   ;;  %p751_p5 = scmp.ne.s32.totalorder %s740_s22, 0 }
  0x78   : > { %p752_p0 = scmp.ge.s32.totalorder %s507_s12, 2  ;;  %s225_s30 = scalar_lea.sflag [#allocation4], %s224_s23 }
  0x7a   : > { %p333_p6 = pnand %p752_p0, %p751_p5 }
  0x7c   : > { %490 = dma.done.wait (!%p333_p6), %s225_s30, 512  }
  0x7d   : > { %492 = vsyncadd (!%p333_p6), %s225_s30, 4294966784  ;;  %p16_p13 = scmp.ge.s32.totalorder %s556_s15, 4   ;;  %s753_s9 = smov %s499_s10 }
  0x7e   : > { %s754_s10 = smov %s503_s11  ;;  %s755_s11 = smov %s568_s18 }
  0x7f   : > { %s756_s12 = smov %s556_s15  ;;  %18 = sbr.rel (!%p16_p13) target bundleno = 6 (0x6), region = 78 }
  0x86   :  { %230 = vsyncpa [#allocation3], 1 }
  0x87   :  { %232 = vsyncpa [#allocation3 + $0x1], 1 }
  0x88   :  { %233 = vsyncpa [#allocation6], 1 }
  0x89   :  { %235 = vsyncpa [#allocation6 + $0x1], 1 }
  0x8a   :  { %236 = vsyncpa [#allocation4], 1 }
  0x8b   :  { %238 = vsyncpa [#allocation4 + $0x1], 1 }

</bundles_post_ra>
